<compile_context>
chip_gen: v7x
topology: tpu7x:2x2x1
jax: 0.10.0
libtpu: 0.0.40
codegen_flags: <defaults>
</compile_context>

<pallas_src>
from functools import partial

import jax
import jax.numpy as jnp
from jax.experimental import pallas as pl
from jax.experimental.pallas import tpu as pltpu


def _rbf_mv_kernel(xa_ref, ya_ref, bT_ref, o_ref, *, use_bf16):
    """Grid = (Np//tm, Mp//tn); axis 1 (j) is the reduction axis.

    Block shapes:
      xa_ref : (Dap, tm)   augmented x   rows = [x^T ; -sq_x ; 1 ; 0-pad]
      ya_ref : (Dap, tn)   augmented y   rows = [2*g*y^T ; 1 ; -sq_y ; 0-pad]
      bT_ref : (Dvp, tn)   b transposed, points on lanes
      o_ref  : (Dvp, tm)   output block, resident across the whole j loop
    """
    j = pl.program_id(1)

    @pl.when(j == 0)
    def _():
        o_ref[...] = jnp.zeros_like(o_ref)

    # Single MXU contraction over the augmented D axis emits -wsd directly:
    #   neg_wsd[jj, ii] = 2 * sum_d g_d y[jj,d] x[ii,d] - ||x_ii||_g^2 - ||y_jj||_g^2
    neg_wsd = jax.lax.dot_general(
        ya_ref[...], xa_ref[...],
        dimension_numbers=(((0,), (0,)), ((), ())),
        preferred_element_type=jnp.float32,
    )                                               # (tn, tm)

    # Clamp tiny positive round-off (cancellation near r=0) so the kernel never exceeds 1;
    # fused as a single min so no extra (tn, tm) pass is added.
    if use_bf16:
        kT = jnp.exp(jnp.minimum(neg_wsd, 0.0).astype(jnp.bfloat16))
        o_ref[...] += jnp.dot(bT_ref[...].astype(jnp.bfloat16), kT,
                              preferred_element_type=jnp.float32)
    else:
        kT = jnp.exp(jnp.minimum(neg_wsd, 0.0))     # 1 EUP push per (i, j) pair -> roofline
        o_ref[...] += jnp.dot(bT_ref[...], kT, preferred_element_type=jnp.float32)


def _round_up(v, m):
    return ((v + m - 1) // m) * m


def _round_down_128(v):
    return max(128, (v // 128) * 128)


def _default_vmem_limit():
    # Generation-aware: ~0.6x of the chip's VMEM capacity (128 MiB v5e/v6e, 64 MiB v7x).
    try:
        cap = pltpu.get_tpu_info().vmem_capacity_bytes
        return int(0.6 * cap)
    except Exception:
        return 48 * 1024 * 1024


def keops_rbf_matvec(ls, x, y, b, *, tm=512, tn=1024, use_bf16=False,
                     vmem_limit_bytes=None):
    """out[i,:] = sum_j exp(-sum_d ls_d*(x[i,d]-y[j,d])**2) * b[j,:], all float32.

    Matches keops_RBFkernel.__matmul__ / forward. x:(N,D), y:(M,D), b:(M,Dv), ls:(D,) or (1,).
    """
    x = jnp.asarray(x, jnp.float32)
    y = jnp.asarray(y, jnp.float32)
    b = jnp.asarray(b, jnp.float32)
    N, D = x.shape
    M, Dv = b.shape
    assert y.shape == (M, D)

    # KeOps WeightedSqDist: scalar lengthscale broadcasts over dimensions.
    ls = jnp.asarray(ls, jnp.float32).reshape(-1)
    if ls.shape[0] == 1:
        ls = jnp.broadcast_to(ls, (D,))
    assert ls.shape[0] == D

    # ---- Hoisted, grid-invariant work (done once, not per grid step) ---------------------
    # Apply g on the y side only (no sqrt, so sign of g is irrelevant for correctness).
    xT = x.T                                              # (D, N)
    yT = y.T                                              # (D, M)
    ygT = ls[:, None] * yT                                # (D, M)  g_d * y
    sq_x = jnp.sum(xT * (ls[:, None] * xT), axis=0)       # (N,)    sum_d g_d x_d^2
    sq_y = jnp.sum(yT * ygT, axis=0)                      # (M,)    sum_d g_d y_d^2

    # Row-augmentation: (Ya^T @ Xa)[j, i] == -wsd_ij, computed by one MXU contraction.
    ones_x = jnp.ones((1, N), jnp.float32)
    ones_y = jnp.ones((1, M), jnp.float32)
    xa = jnp.concatenate([xT, -sq_x[None, :], ones_x], axis=0)       # (D+2, N)
    ya = jnp.concatenate([2.0 * ygT, ones_y, -sq_y[None, :]], axis=0)  # (D+2, M)
    bT = b.T                                                          # (Dv, M)

    # ---- Tile sizing -----------------------------------------------------------------------
    N128, M128 = _round_up(N, 128), _round_up(M, 128)
    tm = max(128, min(tm, N128))
    tn = max(128, min(tn, M128))
    # Keep >= 2 i-tiles when possible so v7x's two TensorCores both get work; near-free on
    # v5e/v6e (one extra grid step at small N).
    if N128 >= 256:
        tm = min(tm, _round_down_128(N128 // 2))

    Da = xa.shape[0]                      # D + 2
    Dap = _round_up(Da, 8)
    Dvp = _round_up(Dv, 8)

    if vmem_limit_bytes is None:
        vmem_limit_bytes = _default_vmem_limit()

    # Shrink tiles until the per-step footprint (intermediates + double-buffered inputs +
    # resident output block) fits comfortably under the VMEM limit (critical on v7x: 64 MiB).
    def _est(tm_, tn_):
        interm = 3 * tn_ * tm_ * 4                              # neg_wsd / kT / staging
        out_blk = Dvp * tm_ * 4                                 # resident accumulator
        dbuf = 2 * 4 * (Dap * tm_ + Dap * tn_ + Dvp * tn_)      # double-buffered inputs
        return interm + out_blk + dbuf

    while _est(tm, tn) > int(0.8 * vmem_limit_bytes) and (tm > 128 or tn > 128):
        if tn >= tm and tn > 128:
            tn = _round_down_128(tn // 2)
        else:
            tm = _round_down_128(tm // 2)

    Np, Mp = _round_up(N, tm), _round_up(M, tn)

    # Zero padding: padded j columns have bT = 0 so they contribute nothing; padded i columns
    # are sliced off. All padded kernel values are exp(<=0), so no overflow/NaN.
    xa = jnp.pad(xa, ((0, Dap - Da), (0, Np - N)))
    ya = jnp.pad(ya, ((0, Dap - Da), (0, Mp - M)))
    bT = jnp.pad(bT, ((0, Dvp - Dv), (0, Mp - M)))

    out_T = pl.pallas_call(
        partial(_rbf_mv_kernel, use_bf16=use_bf16),
        out_shape=jax.ShapeDtypeStruct((Dvp, Np), jnp.float32),
        grid_spec=pltpu.PrefetchScalarGridSpec(
            num_scalar_prefetch=0,
            grid=(Np // tm, Mp // tn),
            in_specs=[
                pl.BlockSpec((Dap, tm), lambda i, j: (0, i)),    # augmented x  (Vi)
                pl.BlockSpec((Dap, tn), lambda i, j: (0, j)),    # augmented y  (Vj)
                pl.BlockSpec((Dvp, tn), lambda i, j: (0, j)),    # b transposed (Vj)
            ],
            out_specs=pl.BlockSpec((Dvp, tm), lambda i, j: (0, i)),
        ),
        compiler_params=pltpu.CompilerParams(
            dimension_semantics=("parallel", "arbitrary"),
            vmem_limit_bytes=int(vmem_limit_bytes),
        ),
    )(xa, ya, bT)

    return out_T[:Dv, :N].T                                      # (N, Dv)


def _reference(ls, x, y, b):
    ls = jnp.asarray(ls, jnp.float32).reshape(-1)
    if ls.shape[0] == 1:
        ls = jnp.broadcast_to(ls, (x.shape[1],))
    d = x[:, None, :] - y[None, :, :]
    wsd = jnp.sum(ls[None, None, :] * d * d, axis=-1)
    return jnp.exp(-wsd) @ b


if __name__ == "__main__":
    key = jax.random.PRNGKey(0)
    k1, k2, k3, k4, k5, k6 = jax.random.split(key, 6)

    ok = True

    # Case 1: exact-tile shapes, per-dimension lengthscale (ls_size == D).
    N, M, D, Dv = 128, 128, 8, 16
    x = jax.random.normal(k1, (N, D), jnp.float32)
    y = jax.random.normal(k2, (M, D), jnp.float32)
    b = jax.random.normal(k3, (M, Dv), jnp.float32)
    ls = jnp.full((D,), 0.5, jnp.float32)
    out = jax.block_until_ready(keops_rbf_matvec(ls, x, y, b))
    ok &= bool(jnp.allclose(out, _reference(ls, x, y, b), rtol=1e-4, atol=1e-4))

    # Case 2: ragged shapes + scalar lengthscale (ls_size == 1); exercises wrapper padding
    # and the >=2 i-tile split.
    N, M, D, Dv = 200, 176, 5, 3
    x = jax.random.normal(k4, (N, D), jnp.float32)
    y = jax.random.normal(k5, (M, D), jnp.float32)
    b = jax.random.normal(k6, (M, Dv), jnp.float32)
    ls = jnp.array([0.7], jnp.float32)
    out = jax.block_until_ready(keops_rbf_matvec(ls, x, y, b))
    ok &= bool(jnp.allclose(out, _reference(ls, x, y, b), rtol=1e-4, atol=1e-4))

    if ok:
        print("KERNEL_OK")
</pallas_src>

<mosaic_0001>
module attributes {stable_mosaic.version = 11 : i64} {
  func.func @_rbf_mv_kernel(%arg0: i32, %arg1: i32, %arg2: memref<16x128xf32, #tpu.memory_space<vmem>>, %arg3: memref<16x128xf32, #tpu.memory_space<vmem>>, %arg4: memref<16x128xf32, #tpu.memory_space<vmem>>, %arg5: memref<16x128xf32, #tpu.memory_space<vmem>>) attributes {dimension_semantics = [#tpu.dimension_semantics<parallel>, #tpu.dimension_semantics<arbitrary>], iteration_bounds = array<i64: 1, 1>, scalar_prefetch = 0 : i64, scratch_operands = 0 : i64, tpu.core_type = #tpu.core_type<tc>, window_params = [{transform_indices = @transform_0, window_bounds = array<i64: 16, 128>}, {transform_indices = @transform_1, window_bounds = array<i64: 16, 128>}, {transform_indices = @transform_2, window_bounds = array<i64: 16, 128>}, {transform_indices = @transform_3, window_bounds = array<i64: 16, 128>}]} {
    %c0_i32 = arith.constant 0 : i32
    %0 = arith.cmpi eq, %arg1, %c0_i32 : i32
    %1 = arith.extui %0 : i1 to i32
    %c0_i32_0 = arith.constant 0 : i32
    %2 = arith.cmpi ne, %1, %c0_i32_0 : i32
    scf.if %2 {
      %cst_12 = arith.constant 0.000000e+00 : f32
      %14 = vector.broadcast %cst_12 : f32 to vector<16x128xf32>
      %c0_13 = arith.constant 0 : index
      %c0_14 = arith.constant 0 : index
      %15 = vector.load %arg5[%c0_13, %c0_14] : memref<16x128xf32, #tpu.memory_space<vmem>>, vector<16x128xf32>
      tpu.vector_store %arg5[%c0_13, %c0_14], %14 {strides = array<i32>} : memref<16x128xf32, #tpu.memory_space<vmem>>, vector<16x128xf32>,
    } else {
    }
    %c0 = arith.constant 0 : index
    %c0_1 = arith.constant 0 : index
    %3 = vector.load %arg3[%c0, %c0_1] : memref<16x128xf32, #tpu.memory_space<vmem>>, vector<16x128xf32>
    %c0_2 = arith.constant 0 : index
    %c0_3 = arith.constant 0 : index
    %4 = vector.load %arg2[%c0_2, %c0_3] : memref<16x128xf32, #tpu.memory_space<vmem>>, vector<16x128xf32>
    %cst = arith.constant dense<0.000000e+00> : vector<128x128xf32>
    %5 = tpu.matmul %3, %4, %cst {dimension_numbers = #tpu.dot_dimension_numbers<[0], [0], [1], [1], [0, 1, 1, 1], [], []>} : vector<16x128xf32>, vector<16x128xf32>, vector<128x128xf32> -> vector<128x128xf32>
    %cst_4 = arith.constant 0.000000e+00 : f32
    %6 = vector.broadcast %cst_4 : f32 to vector<128x128xf32>
    %7 = arith.minimumf %5, %6 : vector<128x128xf32>
    %8 = math.exp %7 : vector<128x128xf32>
    %c0_5 = arith.constant 0 : index
    %c0_6 = arith.constant 0 : index
    %9 = vector.load %arg5[%c0_5, %c0_6] : memref<16x128xf32, #tpu.memory_space<vmem>>, vector<16x128xf32>
    %c0_7 = arith.constant 0 : index
    %c0_8 = arith.constant 0 : index
    %10 = vector.load %arg4[%c0_7, %c0_8] : memref<16x128xf32, #tpu.memory_space<vmem>>, vector<16x128xf32>
    %cst_9 = arith.constant dense<0.000000e+00> : vector<16x128xf32>
    %11 = tpu.matmul %10, %8, %cst_9 {dimension_numbers = #tpu.dot_dimension_numbers<[1], [0], [0], [1], [0, 0, 1, 1], [], []>} : vector<16x128xf32>, vector<128x128xf32>, vector<16x128xf32> -> vector<16x128xf32>
    %12 = arith.addf %9, %11 : vector<16x128xf32>
    %c0_10 = arith.constant 0 : index
    %c0_11 = arith.constant 0 : index
    %13 = vector.load %arg5[%c0_10, %c0_11] : memref<16x128xf32, #tpu.memory_space<vmem>>, vector<16x128xf32>
    tpu.vector_store %arg5[%c0_10, %c0_11], %12 {strides = array<i32>} : memref<16x128xf32, #tpu.memory_space<vmem>>, vector<16x128xf32>,
    return
  }
  func.func @transform_0(%arg0: i32, %arg1: i32) -> (i32, i32) {
    %c0_i32 = arith.constant 0 : i32
    %c0_i32_0 = arith.constant 0 : i32
    return %c0_i32, %arg0 : i32, i32
  }
  func.func @transform_1(%arg0: i32, %arg1: i32) -> (i32, i32) {
    %c0_i32 = arith.constant 0 : i32
    %c0_i32_0 = arith.constant 0 : i32
    return %c0_i32, %arg1 : i32, i32
  }
  func.func @transform_2(%arg0: i32, %arg1: i32) -> (i32, i32) {
    %c0_i32 = arith.constant 0 : i32
    %c0_i32_0 = arith.constant 0 : i32
    return %c0_i32, %arg1 : i32, i32
  }
  func.func @transform_3(%arg0: i32, %arg1: i32) -> (i32, i32) {
    %c0_i32 = arith.constant 0 : i32
    %c0_i32_0 = arith.constant 0 : i32
    return %c0_i32, %arg0 : i32, i32
  }
}

</mosaic_0001>

<bundles_post_ra>
// kernel: tpu_custom_call.1
= control target key start
LH: loop header
LB: loop body
LE: loop exit
PB: predicated region body
PF: predicated region fallthrough
CT: control target
= control target key end

     0   :  { %8 = vsyncpa [#allocation3], 0  ;;  %s834_s0 = inlined_call_operand.hbm [shape: f32[16,128], index: 0, kind: input, shape index: {}]   ;;  %s835_s1 = inlined_call_operand.hbm [shape: f32[16,128], index: 1, kind: input, shape index: {}]   ;;  %s836_s2 = inlined_call_operand.hbm [shape: f32[16,128], index: 2, kind: input, shape index: {}]   ;;  %s837_s3 = inlined_call_operand.hbm [shape: f32[16,128], index: 3, kind: output, shape index: {}]  }
   0x1   :  { %9 = vsyncpa [#allocation6], 0 }
   0x2   :  { %10 = vsyncpa [#allocation4], 0  ;;  %s725_s12 = smov [#allocation5]   ;;  %s726_s14 = smov [#allocation2]  }
   0x3   :  { %s28_s13 = sshll.u32 %s725_s12, 4  ;;  %s16_s15 = sshll.u32 %s726_s14, 4  ;;  %s29_s13 = int_to_ptr.vmem [resolvable:$true] %s28_s13  ;;  %s751_s15 = int_to_ptr.vmem [resolvable:$true] %s16_s15 }
   0x4   :  { %s631_s18 = scalar_lea.hbm %s835_s1, 256 }
   0x5   :  { %p632_p0 = scmp.ne.s32.totalorder %s835_s1, %s631_s18  ;;  %p635_p1 = scmp.lt.u32.totalorder %s631_s18, %s835_s1 }
   0x7   :  { %p637_p2 = pnand %p635_p1, %p632_p0 }
   0x9   :  { %640 = shalt.err (!%p637_p2)
}
   0xa   :  { %s641_s23 = scalar_lea.vmem %s29_s13, 256  ;;  %p646_p4 = scmp.lt.s32.totalorder %s29_s13, %s29_s13 }
   0xb   :  { %p642_p3 = scmp.ne.s32.totalorder %s29_s13, %s641_s23  ;;  %p647_p5 = scmp.lt.s32.totalorder %s641_s23, %s641_s23 }
   0xd   :  { %p648_p6 = por %p647_p5, %p646_p4 }
   0xf   :  { %p649_p7 = pnand %p648_p6, %p642_p3 }
  0x11   :  { %652 = shalt.err (!%p649_p7)
}
  0x12   :  { %s727_s24 = smov 128   ;;  %s728_s25 = smov 8  }
  0x13   :  { %34 = dma.hbm_to_vmem [thread:$0]  %s835_s1, 256, %s29_s13, [#allocation6], %s727_s24, %s727_s24, %s728_s25  }
  0x14   :  { %s653_s30 = scalar_lea.hbm %s834_s0, 256 }
  0x15   :  { %p654_p8 = scmp.ne.s32.totalorder %s834_s0, %s653_s30  ;;  %p657_p9 = scmp.lt.u32.totalorder %s653_s30, %s834_s0 }
  0x17   :  { %p659_p10 = pnand %p657_p9, %p654_p8 }
  0x19   :  { %662 = shalt.err (!%p659_p10)
}
  0x1a   :  { %s663_s8 = scalar_lea.vmem %s751_s15, 256  ;;  %p668_p12 = scmp.lt.s32.totalorder %s751_s15, %s751_s15 }
  0x1b   :  { %p664_p11 = scmp.ne.s32.totalorder %s751_s15, %s663_s8  ;;  %p669_p13 = scmp.lt.s32.totalorder %s663_s8, %s663_s8 }
  0x1d   :  { %p670_p0 = por %p669_p13, %p668_p12 }
  0x1f   :  { %p671_p1 = pnand %p670_p0, %p664_p11 }
  0x21   :  { %674 = shalt.err (!%p671_p1)
}
  0x22   :  { %22 = dma.hbm_to_vmem [thread:$0]  %s834_s0, 256, %s751_s15, [#allocation3], %s727_s24, %s727_s24, %s728_s25  }
  0x23   :  { %s729_s10 = smov [#allocation7]   ;;  %s675_s14 = scalar_lea.hbm %s836_s2, 256 }
  0x24   :  { %s40_s11 = sshll.u32 %s729_s10, 4  ;;  %p676_p2 = scmp.ne.s32.totalorder %s836_s2, %s675_s14  ;;  %s41_s11 = int_to_ptr.vmem [resolvable:$true] %s40_s11 }
  0x25   :  { %p679_p3 = scmp.lt.u32.totalorder %s675_s14, %s836_s2 }
  0x27   :  { %p681_p4 = pnand %p679_p3, %p676_p2 }
  0x29   :  { %684 = shalt.err (!%p681_p4)
}
  0x2a   :  { %s685_s20 = scalar_lea.vmem %s41_s11, 256  ;;  %p690_p6 = scmp.lt.s32.totalorder %s41_s11, %s41_s11 }
  0x2b   :  { %p686_p5 = scmp.ne.s32.totalorder %s41_s11, %s685_s20  ;;  %p691_p7 = scmp.lt.s32.totalorder %s685_s20, %s685_s20 }
  0x2d   :  { %p692_p8 = por %p691_p7, %p690_p6 }
  0x2f   :  { %p693_p9 = pnand %p692_p8, %p686_p5 }
  0x31   :  { %696 = shalt.err (!%p693_p9)
}
  0x32   :  { %46 = dma.hbm_to_vmem [thread:$0]  %s836_s2, 256, %s41_s11, [#allocation6], %s727_s24, %s727_s24, %s728_s25  }
  0x33   :  { %719 = dma.done.wait [#allocation3], 256  }
  0x34   :  { %720 = vsyncadd [#allocation3], 4294967040 }
  0x35   :  { %721 = dma.done.wait [#allocation6], 512  }
  0x36   :  { %722 = vsyncadd [#allocation6], 4294966784  ;;  %v62_v0 = vld [vmem:[#allocation5] sm:$0xff]  ;;  %v64_v1 = vld [vmem:[#allocation2] sm:$0xff]  ;;  %vm98_vm0 = vcmask 130048   ;;  %s730_s2 = smov [#allocation8]  }
  0x37   :  { %66 = vxpose.xlu0.b32.start [1/2] (short) %v62_v0, 128  ;;  %v65_v2 = vld [vmem:[#allocation2 + $0x8] sm:$0xff]  ;;  %v63_v3 = vld [vmem:[#allocation5 + $0x8] sm:$0xff]  ;;  %v342_v21 = vld [vmem:[#allocation7] sm:$0xff]  ;;  %s428_s21 = sshll.u32 %s730_s2, 4  ;;  %s429_s21 = int_to_ptr.vmem [resolvable:$true] %s428_s21 }
  0x38   :  { %v556_v4 = vpack.c.bf16 %v65_v2, %v64_v1  ;;  %553 = vmatprep.mubr.f32.mxu1 %v342_v21  ;;  %s697_s22 = scalar_lea.vmem %s429_s21, 256  ;;  %p702_p11 = scmp.lt.s32.totalorder %s429_s21, %s429_s21 }
  0x39   :  { %p698_p10 = scmp.ne.s32.totalorder %s429_s21, %s697_s22  ;;  %p703_p12 = scmp.lt.s32.totalorder %s697_s22, %s697_s22 }
  0x3a   :  { %557 = vmatprep.subr.bf16.mxu0 %v556_v4 }
  0x3b   :  { %67 = vxpose.xlu0.b32.end [2/2] (short) %v63_v3, 128  ;;  %559 = vmatpush3.bf16.msra.mxu0 %v556_v4  ;;  %p704_p13 = por %p703_p12, %p702_p11 }
  0x3d   :  { %p705_p0 = pnand %p704_p13, %p698_p10 }
  0xb7   :  { %v82_v5 = vpop.trf.xlu0 }
  0xb8   :  { %497 = vmatprep.mubr.msk.f32.mxu0 %vm98_vm0, %v82_v5 }
  0xbb   :  { %v83_v6 = vpop.trf.xlu0 }
  0xbc   :  { %498 = vmatmul.mubr.msk.f32.vlgmr.msra.gmra.mrb[0].mxu0 %vm98_vm0, %v83_v6 }
  0xbf   :  { %v84_v7 = vpop.trf.xlu0 }
  0xc0   :  { %500 = vmatprep.mubr.msk.f32.mxu0 %vm98_vm0, %v84_v7 }
  0xc3   :  { %v85_v8 = vpop.trf.xlu0 }
  0xc4   :  { %501 = vmatmul.mubr.msk.f32.gmra.mrb[2].mxu0 %vm98_vm0, %v85_v8 }
  0xc7   :  { %v86_v9 = vpop.trf.xlu0 }
  0xc8   :  { %503 = vmatprep.mubr.msk.f32.mxu0 %vm98_vm0, %v86_v9 }
  0xcb   :  { %v87_v10 = vpop.trf.xlu0 }
  0xcc   :  { %504 = vmatmul.mubr.msk.f32.gmra.mrb[4].mxu0 %vm98_vm0, %v87_v10 }
  0xcf   :  { %v88_v11 = vpop.trf.xlu0 }
  0xd0   :  { %506 = vmatprep.mubr.msk.f32.mxu0 %vm98_vm0, %v88_v11 }
  0xd3   :  { %v89_v12 = vpop.trf.xlu0 }
  0xd4   :  { %507 = vmatmul.mubr.msk.f32.gmra.mrb[6].mxu0 %vm98_vm0, %v89_v12 }
  0xd7   :  { %v90_v13 = vpop.trf.xlu0 }
  0xd8   :  { %509 = vmatprep.mubr.msk.f32.mxu0 %vm98_vm0, %v90_v13 }
  0xdb   :  { %v91_v14 = vpop.trf.xlu0 }
  0xdc   :  { %510 = vmatmul.mubr.msk.f32.gmra.mrb[8].mxu0 %vm98_vm0, %v91_v14 }
  0xdf   :  { %v92_v15 = vpop.trf.xlu0 }
  0xe0   :  { %512 = vmatprep.mubr.msk.f32.mxu0 %vm98_vm0, %v92_v15 }
  0xe3   :  { %v93_v16 = vpop.trf.xlu0 }
  0xe4   :  { %513 = vmatmul.mubr.msk.f32.gmra.mrb[10].mxu0 %vm98_vm0, %v93_v16 }
  0xe7   :  { %v94_v17 = vpop.trf.xlu0 }
  0xe8   :  { %515 = vmatprep.mubr.msk.f32.mxu0 %vm98_vm0, %v94_v17 }
  0xeb   :  { %v95_v18 = vpop.trf.xlu0 }
  0xec   :  { %516 = vmatmul.mubr.msk.f32.gmra.mrb[12].mxu0 %vm98_vm0, %v95_v18 }
  0xef   :  { %v96_v19 = vpop.trf.xlu0 }
  0xf0   :  { %518 = vmatprep.mubr.msk.f32.mxu0 %vm98_vm0, %v96_v19 }
  0xf3   :  { %v97_v20 = vpop.trf.xlu0 }
  0xf4   :  { %519 = vmatmul.mubr.msk.f32.gmra.mrb[14].mxu0 %vm98_vm0, %v97_v20 }
 0x18f   :  { %v499_v22 = vpop.f32.mrb[0].mxu0 }
 0x190   :  { %v293_v23 = vmin.f32 %v499_v22, 0.0  ;;  %v213_v24 = vpop.f32.mrb[1].mxu0 }
 0x191   :  { %v292_v25 = vmin.f32 %v213_v24, 0.0 }
 0x192   :  { %v310_v26 = vmul.f32 1.442695, %v293_v23 }
 0x193   :  { %v308_v27 = vmul.f32 1.442695, %v292_v25 }
 0x194   :  { %599 = vpow2.f32 %v310_v26 }
 0x195   :  { %601 = vpow2.f32 %v308_v27 }
 0x197   :  { %v502_v28 = vpop.f32.mrb[2].mxu0 }
 0x198   :  { %v295_v29 = vmin.f32 %v502_v28, 0.0  ;;  %v223_v30 = vpop.f32.mrb[3].mxu0 }
 0x199   :  { %v294_v31 = vmin.f32 %v223_v30, 0.0  ;;  %v343_v30 = vld [vmem:[#allocation7 + $0x8] sm:$0xff] }
 0x19a   :  { %v314_v32 = vmul.f32 1.442695, %v295_v29 }
 0x19b   :  { %v312_v33 = vmul.f32 1.442695, %v294_v31 }
 0x19c   :  { %603 = vpow2.f32 %v314_v32 }
 0x19d   :  { %605 = vpow2.f32 %v312_v33 }
 0x19e   :  { %v600_v34 = vpop.eup %599 }
 0x19f   :  { %v602_v35 = vpop.eup %601  ;;  %v505_v36 = vpop.f32.mrb[4].mxu0 }
 0x1a0   :  { %v297_v37 = vmin.f32 %v505_v36, 0.0  ;;  %v233_v38 = vpop.f32.mrb[5].mxu0  ;;  %v560_v39 = vpack.c.bf16 %v600_v34, %v602_v35 }
 0x1a1   :  { %v296_v40 = vmin.f32 %v233_v38, 0.0 }
 0x1a2   :  { %v318_v41 = vmul.f32 1.442695, %v297_v37  ;;  %561 = vmatprep.subr.bf16.mxu1 %v560_v39 }
 0x1a3   :  { %v316_v42 = vmul.f32 1.442695, %v296_v40  ;;  %563 = vmatpush3.bf16.msra.mxu1 %v560_v39 }
 0x1a4   :  { %607 = vpow2.f32 %v318_v41 }
 0x1a5   :  { %609 = vpow2.f32 %v316_v42 }
 0x1a6   :  { %v604_v43 = vpop.eup %603 }
 0x1a7   :  { %v606_v44 = vpop.eup %605  ;;  %v508_v45 = vpop.f32.mrb[6].mxu0 }
 0x1a8   :  { %v299_v46 = vmin.f32 %v508_v45, 0.0  ;;  %v243_v47 = vpop.f32.mrb[7].mxu0  ;;  %v564_v48 = vpack.c.bf16 %v604_v43, %v606_v44 }
 0x1a9   :  { %v298_v49 = vmin.f32 %v243_v47, 0.0 }
 0x1aa   :  { %v322_v50 = vmul.f32 1.442695, %v299_v46  ;;  %565 = vmatprep.subr.bf16.mxu1 %v564_v48 }
 0x1ab   :  { %v320_v51 = vmul.f32 1.442695, %v298_v49  ;;  %567 = vmatpush3.bf16.msra.mxu1 %v564_v48 }
 0x1ac   :  { %611 = vpow2.f32 %v322_v50 }
 0x1ad   :  { %613 = vpow2.f32 %v320_v51 }
 0x1ae   :  { %v608_v52 = vpop.eup %607 }
 0x1af   :  { %v610_v53 = vpop.eup %609  ;;  %v511_v54 = vpop.f32.mrb[8].mxu0 }
 0x1b0   :  { %v301_v55 = vmin.f32 %v511_v54, 0.0  ;;  %v253_v56 = vpop.f32.mrb[9].mxu0  ;;  %v568_v57 = vpack.c.bf16 %v608_v52, %v610_v53 }
 0x1b1   :  { %v300_v58 = vmin.f32 %v253_v56, 0.0 }
 0x1b2   :  { %v326_v59 = vmul.f32 1.442695, %v301_v55  ;;  %569 = vmatprep.subr.bf16.mxu1 %v568_v57 }
 0x1b3   :  { %v324_v60 = vmul.f32 1.442695, %v300_v58  ;;  %571 = vmatpush3.bf16.msra.mxu1 %v568_v57 }
 0x1b4   :  { %615 = vpow2.f32 %v326_v59 }
 0x1b5   :  { %617 = vpow2.f32 %v324_v60 }
 0x1b6   :  { %v612_v61 = vpop.eup %611 }
 0x1b7   :  { %v614_v62 = vpop.eup %613  ;;  %v514_v63 = vpop.f32.mrb[10].mxu0 }
 0x1b8   :  { %v303_v0 = vmin.f32 %v514_v63, 0.0  ;;  %v263_v1 = vpop.f32.mrb[11].mxu0  ;;  %v572_v2 = vpack.c.bf16 %v612_v61, %v614_v62 }
 0x1b9   :  { %v302_v3 = vmin.f32 %v263_v1, 0.0 }
 0x1ba   :  { %v330_v4 = vmul.f32 1.442695, %v303_v0  ;;  %573 = vmatprep.subr.bf16.mxu1 %v572_v2 }
 0x1bb   :  { %v328_v5 = vmul.f32 1.442695, %v302_v3  ;;  %575 = vmatpush3.bf16.msra.mxu1 %v572_v2 }
 0x1bc   :  { %619 = vpow2.f32 %v330_v4 }
 0x1bd   :  { %621 = vpow2.f32 %v328_v5 }
 0x1be   :  { %v616_v6 = vpop.eup %615 }
 0x1bf   :  { %v618_v7 = vpop.eup %617  ;;  %v517_v8 = vpop.f32.mrb[12].mxu0 }
 0x1c0   :  { %v305_v9 = vmin.f32 %v517_v8, 0.0  ;;  %v273_v10 = vpop.f32.mrb[13].mxu0  ;;  %v576_v11 = vpack.c.bf16 %v616_v6, %v618_v7 }
 0x1c1   :  { %v304_v12 = vmin.f32 %v273_v10, 0.0 }
 0x1c2   :  { %v334_v13 = vmul.f32 1.442695, %v305_v9  ;;  %577 = vmatprep.subr.bf16.mxu1 %v576_v11 }
 0x1c3   :  { %v332_v14 = vmul.f32 1.442695, %v304_v12  ;;  %579 = vmatpush3.bf16.msra.mxu1 %v576_v11 }
 0x1c4   :  { %623 = vpow2.f32 %v334_v13 }
 0x1c5   :  { %625 = vpow2.f32 %v332_v14 }
 0x1c6   :  { %v620_v15 = vpop.eup %619 }
 0x1c7   :  { %v622_v16 = vpop.eup %621  ;;  %v520_v17 = vpop.f32.mrb[14].mxu0 }
 0x1c8   :  { %v307_v18 = vmin.f32 %v520_v17, 0.0  ;;  %v283_v19 = vpop.f32.mrb[15].mxu0  ;;  %v580_v20 = vpack.c.bf16 %v620_v15, %v622_v16 }
 0x1c9   :  { %v306_v21 = vmin.f32 %v283_v19, 0.0 }
 0x1ca   :  { %v338_v22 = vmul.f32 1.442695, %v307_v18  ;;  %581 = vmatprep.subr.bf16.mxu1 %v580_v20 }
 0x1cb   :  { %v336_v23 = vmul.f32 1.442695, %v306_v21  ;;  %583 = vmatpush3.bf16.msra.mxu1 %v580_v20 }
 0x1cc   :  { %627 = vpow2.f32 %v338_v22 }
 0x1cd   :  { %629 = vpow2.f32 %v336_v23 }
 0x1ce   :  { %v624_v24 = vpop.eup %623 }
 0x1cf   :  { %v626_v25 = vpop.eup %625 }
 0x1d0   :  { %v584_v26 = vpack.c.bf16 %v624_v24, %v626_v25 }
 0x1d2   :  { %585 = vmatprep.subr.bf16.mxu1 %v584_v26 }
 0x1d3   :  { %587 = vmatpush3.bf16.msra.mxu1 %v584_v26 }
 0x1d6   :  { %v628_v27 = vpop.eup %627 }
 0x1d7   :  { %v630_v28 = vpop.eup %629 }
 0x1d8   :  { %v588_v29 = vpack.c.bf16 %v628_v27, %v630_v28 }
 0x1da   :  { %589 = vmatprep.subr.bf16.mxu1 %v588_v29 }
 0x1db   :  { %591 = vmatpush3.bf16.msra.mxu1 %v588_v29 }
 0x1de   :  { %554 = vmatmul.mubr.f32.vlgmr.msra.gmra.mrb[0].mxu1 %v343_v30 }
 0x2b1   :  { %v555_v31 = vpop.f32.mrb[0].mxu1 }
 0x2b2   :  { %v410_v32 = vpop.f32.mrb[1].mxu1  ;;  %422 = vst [vmem:[#allocation8 + $0x8] sm:$0xff] %v555_v31 }
 0x2b3   :  { %421 = vst [vmem:[#allocation8] sm:$0xff] %v410_v32 }
 0x2b4   :  { %708 = shalt.err (!%p705_p0)
}
 0x2b5   :  { %s709_s27 = scalar_lea.hbm %s837_s3, 256 }
 0x2b6   :  { %p710_p1 = scmp.ne.s32.totalorder %s837_s3, %s709_s27  ;;  %p713_p2 = scmp.lt.u32.totalorder %s709_s27, %s837_s3 }
 0x2b8   :  { %p715_p3 = pnand %p713_p2, %p710_p1 }
 0x2ba   :  { %718 = shalt.err (!%p715_p3)
}
 0x2bb   :  { %434 = dma.vmem_to_hbm [thread:$0]  %s429_s21, 256, %s837_s3, [#allocation4], %s727_s24, %s727_s24, %s728_s25  }
 0x2bc   :  { %723 = dma.done.wait [#allocation4], 256  }
 0x2bd   :  { %724 = vsyncadd [#allocation4], 4294967040 }
 0x2be   :  { %438 = vsyncpa [#allocation3], 1 }
 0x2bf   :  { %439 = vsyncpa [#allocation6], 1 }
 0x2c0   :  { %440 = vsyncpa [#allocation4], 1 }

</bundles_post_ra>
